<compile_context>
chip_gen: v7x
topology: tpu7x:2x2x1
jax: 0.10.0
libtpu: 0.0.40
codegen_flags: <defaults>
</compile_context>

<pallas_src>
import functools

import jax
import jax.numpy as jnp
from jax.experimental import pallas as pl
from jax.experimental.pallas import tpu as pltpu


def _round_up(x: int, m: int) -> int:
    return (x + m - 1) // m * m


def _lsce_kernel(targets_ref, preds_ref, contrib_ref, *,
                 eps: float, n_rows: int, n_cls: int):
    # targets_ref: (TM, 1) int32 VMEM block
    # preds_ref:   (TM, C) VMEM block (native dtype)
    # contrib_ref: (TM, 1) f32 per-row partial output block
    i = pl.program_id(0)

    x = preds_ref[...].astype(jnp.float32)                   # (TM, C)
    tm = x.shape[0]

    # Numerically stable softmax statistics along the class (lane) axis.
    row_max = jnp.max(x, axis=-1, keepdims=True)             # (TM, 1)
    shifted = x - row_max                                    # (TM, C)
    lse = jnp.log(jnp.sum(jnp.exp(shifted), axis=-1, keepdims=True))  # (TM, 1)

    # Fused weighted reduction: eps/C on every class, +(1-eps) on the target
    # class (compare+select, no one-hot matmul).  The lse coefficient is
    # exactly eps/C * C + (1-eps) = 1, folded analytically.
    a = jnp.float32(eps / n_cls)
    b = jnp.float32(1.0 - eps)
    tgt = targets_ref[...]                                   # (TM, 1) int32
    col = jax.lax.broadcasted_iota(jnp.int32, x.shape, 1)    # (TM, C)
    w = jnp.where(col == tgt, a + b, a)                      # (TM, C)
    weighted = jnp.sum(w * shifted, axis=-1, keepdims=True)  # (TM, 1)

    contrib = weighted - lse                                 # (TM, 1)

    # Mask rows beyond the original N (wrapper pads rows to a multiple of TM).
    row_id = i * tm + jax.lax.broadcasted_iota(jnp.int32, (tm, 1), 0)
    contrib_ref[...] = jnp.where(row_id < n_rows, contrib, 0.0)


def _pick_tile_rows(n: int, c: int, itemsize: int):
    """Generation-aware row-tile size and the VMEM capacity it was sized for."""
    # Sublane packing: 8 rows for 4-byte, 16 for bf16, 32 for int8/fp8 inputs.
    packing = max(8, 32 // max(itemsize, 1))

    try:
        info = pltpu.get_tpu_info()
        vmem_cap = int(getattr(info, "vmem_capacity_bytes", 64 << 20))
    except Exception:
        vmem_cap = 64 << 20  # conservative (v7x-sized) fallback

    # Working-set budget per generation: generous on 128 MiB parts (v5e/v6e),
    # careful on v7x's 64 MiB per TensorCore.
    budget = (72 << 20) if vmem_cap >= (128 << 20) else (40 << 20)

    # Working set per row: double-buffered native input tile plus ~5 f32
    # tile-sized temporaries (f32 cast, shifted, exp, weight, product).
    bytes_per_row = c * (2 * itemsize + 5 * 4)
    tm_max = max(packing, (budget // max(bytes_per_row, 1)) // packing * packing)

    # Minimize padding: smallest TM (multiple of packing) that still needs no
    # more grid steps than tm_max would.
    num_blocks = pl.cdiv(n, tm_max)
    tm = _round_up(pl.cdiv(n, num_blocks), packing)
    return tm, vmem_cap


def label_smooth_cross_entropy(preds: jax.Array, targets: jax.Array,
                               eps: float) -> jax.Array:
    """Pallas implementation of LabelSmoothCrossEntropy.forward (weight=None)."""
    n, c = preds.shape
    if n == 0:
        return jnp.float32(float("nan"))  # mean over an empty batch

    itemsize = jnp.dtype(preds.dtype).itemsize
    tm, vmem_cap = _pick_tile_rows(n, c, itemsize)

    # Pad rows to a multiple of the row tile; padded rows are masked in-kernel.
    n_pad = _round_up(n, tm)
    if n_pad != n:
        preds = jnp.pad(preds, ((0, n_pad - n), (0, 0)))
        targets = jnp.pad(targets, (0, n_pad - n))
    targets_2d = targets.astype(jnp.int32).reshape(n_pad, 1)

    grid = (n_pad // tm,)

    # VMEM budget: double-buffered native input tile + f32 working set +
    # headroom, clamped below the physical capacity of this generation.
    work = 2 * tm * c * itemsize + 5 * tm * c * 4 + (2 << 20)
    vmem_limit = int(min(vmem_cap - (8 << 20), max(32 << 20, work)))

    contribs = pl.pallas_call(
        functools.partial(_lsce_kernel, eps=float(eps), n_rows=n, n_cls=c),
        out_shape=jax.ShapeDtypeStruct((n_pad, 1), jnp.float32),
        grid=grid,
        in_specs=[
            pl.BlockSpec((tm, 1), lambda i: (i, 0)),   # targets (TM, 1) int32
            pl.BlockSpec((tm, c), lambda i: (i, 0)),   # preds   (TM, C)
        ],
        out_specs=pl.BlockSpec((tm, 1), lambda i: (i, 0)),  # per-row partials
        compiler_params=pltpu.CompilerParams(
            dimension_semantics=("parallel",),
            vmem_limit_bytes=vmem_limit),
    )(targets_2d, preds)

    # Tiny final reduction + scaling outside the kernel (padded rows are 0).
    return -jnp.sum(contribs) / jnp.float32(n)


def _reference(preds, targets, eps):
    log_preds = jax.nn.log_softmax(preds.astype(jnp.float32), axis=-1)
    n_cls = preds.shape[-1]
    loss = -jnp.mean(jnp.sum(log_preds, axis=-1))
    nll = -jnp.mean(jnp.take_along_axis(log_preds, targets[:, None], axis=-1))
    return eps * (loss / n_cls) + (1.0 - eps) * nll


if __name__ == "__main__":
    key = jax.random.PRNGKey(0)
    k_preds, k_tgt = jax.random.split(key)

    batch, num_classes = 8, 32
    eps = 0.1

    preds = jax.random.normal(k_preds, (batch, num_classes), dtype=jnp.float32)
    targets = jax.random.randint(k_tgt, (batch,), 0, num_classes, dtype=jnp.int32)

    out = label_smooth_cross_entropy(preds, targets, eps)
    out = jax.block_until_ready(out)

    ref = _reference(preds, targets, eps)
    assert jnp.allclose(out, ref, rtol=1e-5, atol=1e-5), (out, ref)

    print("KERNEL_OK")
</pallas_src>

<mosaic_0001>
module attributes {stable_mosaic.version = 11 : i64} {
  func.func @_lsce_kernel(%arg0: i32, %arg1: memref<8x1xi32, #tpu.memory_space<vmem>>, %arg2: memref<8x32xf32, #tpu.memory_space<vmem>>, %arg3: memref<8x1xf32, #tpu.memory_space<vmem>>) attributes {dimension_semantics = [#tpu.dimension_semantics<parallel>], iteration_bounds = array<i64: 1>, scalar_prefetch = 0 : i64, scratch_operands = 0 : i64, tpu.core_type = #tpu.core_type<tc>, window_params = [{transform_indices = @transform_0, window_bounds = array<i64: 8, 1>}, {transform_indices = @transform_1, window_bounds = array<i64: 8, 32>}, {transform_indices = @transform_2, window_bounds = array<i64: 8, 1>}]} {
    %c0 = arith.constant 0 : index
    %c0_0 = arith.constant 0 : index
    %0 = vector.load %arg2[%c0, %c0_0] : memref<8x32xf32, #tpu.memory_space<vmem>>, vector<8x32xf32>
    %cst = arith.constant dense<0xFF800000> : vector<8xf32>
    %1 = vector.multi_reduction <maximumf>, %0, %cst [1] : vector<8x32xf32> to vector<8xf32>
    %2 = vector.shape_cast %1 : vector<8xf32> to vector<8x1xf32>
    %3 = vector.broadcast %2 : vector<8x1xf32> to vector<8x32xf32>
    %4 = arith.subf %0, %3 : vector<8x32xf32>
    %5 = math.exp %4 : vector<8x32xf32>
    %cst_1 = arith.constant dense<0.000000e+00> : vector<8xf32>
    %6 = vector.multi_reduction <add>, %5, %cst_1 [1] : vector<8x32xf32> to vector<8xf32>
    %7 = vector.shape_cast %6 : vector<8xf32> to vector<8x1xf32>
    %8 = math.log %7 : vector<8x1xf32>
    %c0_2 = arith.constant 0 : index
    %c0_3 = arith.constant 0 : index
    %9 = vector.load %arg1[%c0_2, %c0_3] : memref<8x1xi32, #tpu.memory_space<vmem>>, vector<8x1xi32>
    %10 = tpu.iota {dimensions = array<i32: 1>} : vector<8x32xi32>
    %11 = vector.broadcast %9 : vector<8x1xi32> to vector<8x32xi32>
    %12 = arith.cmpi eq, %10, %11 : vector<8x32xi32>
    %cst_4 = arith.constant 3.125000e-03 : f32
    %cst_5 = arith.constant 0.899999976 : f32
    %13 = arith.addf %cst_4, %cst_5 : f32
    %cst_6 = arith.constant 3.125000e-03 : f32
    %14 = vector.broadcast %13 : f32 to vector<8x32xf32>
    %15 = vector.broadcast %cst_6 : f32 to vector<8x32xf32>
    %16 = arith.select %12, %14, %15 : vector<8x32xi1>, vector<8x32xf32>
    %17 = arith.mulf %16, %4 : vector<8x32xf32>
    %cst_7 = arith.constant dense<0.000000e+00> : vector<8xf32>
    %18 = vector.multi_reduction <add>, %17, %cst_7 [1] : vector<8x32xf32> to vector<8xf32>
    %19 = vector.shape_cast %18 : vector<8xf32> to vector<8x1xf32>
    %20 = arith.subf %19, %8 : vector<8x1xf32>
    %c8_i32 = arith.constant 8 : i32
    %21 = arith.muli %arg0, %c8_i32 : i32
    %22 = tpu.iota {dimensions = array<i32: 0>} : vector<8x1xi32>
    %23 = vector.broadcast %21 : i32 to vector<8x1xi32>
    %24 = arith.addi %23, %22 : vector<8x1xi32>
    %c8_i32_8 = arith.constant 8 : i32
    %25 = vector.broadcast %c8_i32_8 : i32 to vector<8x1xi32>
    %26 = arith.cmpi slt, %24, %25 : vector<8x1xi32>
    %cst_9 = arith.constant 0.000000e+00 : f32
    %27 = vector.broadcast %cst_9 : f32 to vector<8x1xf32>
    %28 = arith.select %26, %20, %27 : vector<8x1xi1>, vector<8x1xf32>
    %c0_10 = arith.constant 0 : index
    %c0_11 = arith.constant 0 : index
    %29 = vector.load %arg3[%c0_10, %c0_11] : memref<8x1xf32, #tpu.memory_space<vmem>>, vector<8x1xf32>
    tpu.vector_store %arg3[%c0_10, %c0_11], %28 {strides = array<i32>} : memref<8x1xf32, #tpu.memory_space<vmem>>, vector<8x1xf32>,
    return
  }
  func.func @transform_0(%arg0: i32) -> (i32, i32) {
    %c0_i32 = arith.constant 0 : i32
    %c0_i32_0 = arith.constant 0 : i32
    return %arg0, %c0_i32 : i32, i32
  }
  func.func @transform_1(%arg0: i32) -> (i32, i32) {
    %c0_i32 = arith.constant 0 : i32
    %c0_i32_0 = arith.constant 0 : i32
    return %arg0, %c0_i32 : i32, i32
  }
  func.func @transform_2(%arg0: i32) -> (i32, i32) {
    %c0_i32 = arith.constant 0 : i32
    %c0_i32_0 = arith.constant 0 : i32
    return %arg0, %c0_i32 : i32, i32
  }
}

</mosaic_0001>

<bundles_post_ra>
// kernel: tpu_custom_call.1
= control target key start
LH: loop header
LB: loop body
LE: loop exit
PB: predicated region body
PF: predicated region fallthrough
CT: control target
= control target key end

     0   :  { %vm12_vm0 = vcmask 261120   ;;  %v57_v1 = vmov 0   ;;  %v25_v6 = vlaneseq  ;;  %v58_v10 = vmov 0.003125   ;;  %s86_s1 = inlined_call_operand.vmem [shape: f32[8,32], index: 1, kind: input, shape index: {}]   ;;  %s87_s0 = inlined_call_operand.vmem [shape: s32[8,1], index: 0, kind: input, shape index: {}]   ;;  %s88_s2 = inlined_call_operand.vmem [shape: f32[8,1], index: 2, kind: output, shape index: {}]  }
   0x1   :  { %v11_v0 = vld [vmem:[%s86_s1] sm:$0xff]  ;;  %52 = vset.pattern.permute.xlu0 %v57_v1  ;;  %vm44_vm2 = vcmask 7168  }
   0x2   :  { %v13_v2 = vsel %vm12_vm0, %v11_v0, -inf  ;;  %v24_v3 = vld [vmem:[%s87_s0] sm:$0xff]  ;;  %v26_v8 = vand.u32 127, %v25_v6 }
   0x3   :  { %14 = vmax.xlane.f32.xlu0 %v13_v2 }
  0x19   :  { %28 = vperm.xlu0 %52, %v24_v3  }
  0x90   :  { %v15_v4 = vpop.xlane.xlu0 %14 }
  0x91   :  { %v16_v5 = vsub.f32 %v11_v0, %v15_v4 }
  0x93   :  { %v17_v7 = vmul.f32 1.442695, %v16_v5 }
  0x95   :  { %53 = vpow2.f32 %v17_v7 }
  0x98   :  { %v29_v9 = vpop.permute.xlu0 %28 }
  0x99   :  { %vm30_vm1 = vcmp.eq.s32.totalorder %v26_v8, %v29_v9 }
  0x9a   :  { %v31_v11 = vsel %vm30_vm1, 0.903125, %v58_v10 }
  0x9b   :  { %v32_v14 = vmul.f32 %v31_v11, %v16_v5 }
  0x9d   :  { %v33_v15 = vsel %vm12_vm0, %v32_v14, 0.0 }
  0x9f   :  { %v54_v12 = vpop.eup %53 }
  0xa0   :  { %v19_v13 = vsel %vm12_vm0, %v54_v12, 0.0 }
  0xa1   :  { %20 = vadd.xlane.f32.xlu1 %v19_v13 }
  0xa5   :  { %34 = vadd.xlane.f32.xlu1 %v33_v15 }
 0x12e   :  { %v21_v16 = vpop.xlane.xlu1 %20 }
 0x12f   :  { %55 = vlog2.f32 %v21_v16 }
 0x132   :  { %v35_v19 = vpop.xlane.xlu1 %34 }
 0x139   :  { %v56_v17 = vpop.eup %55 }
 0x13a   :  { %v23_v18 = vmul.f32 0.6931472, %v56_v17 }
 0x13c   :  { %v36_v20 = vsub.f32 %v35_v19, %v23_v18 }
 0x13e   :  { %45 = vst.msk [vmem:[%s88_s2] sm:$0xff] %vm44_vm2, %v36_v20 }

</bundles_post_ra>
